<compile_context>
chip_gen: v7x
topology: tpu7x:2x2x1
jax: 0.10.0
libtpu: 0.0.40
codegen_flags: <defaults>
</compile_context>

<pallas_src>
import functools

import numpy as np
import jax
import jax.numpy as jnp
from jax import lax
from jax.experimental import pallas as pl
from jax.experimental.pallas import tpu as pltpu


# ---------------------------------------------------------------------------
# Kernel: two small MXU matmuls per batch tile, f32 accumulation.
# ---------------------------------------------------------------------------
def _fourier_basis_kernel(theta_f_ref, theta_b_ref, fbasis_ref, bbasis_ref,
                          forecast_ref, backcast_ref, *, precision):
    forecast_ref[...] = jnp.dot(
        theta_f_ref[...], fbasis_ref[...],
        preferred_element_type=jnp.float32, precision=precision,
    ).astype(forecast_ref.dtype)
    backcast_ref[...] = jnp.dot(
        theta_b_ref[...], bbasis_ref[...],
        preferred_element_type=jnp.float32, precision=precision,
    ).astype(backcast_ref.dtype)


# ---------------------------------------------------------------------------
# Basis construction (mirrors fourier_basis.__init__ buffers exactly).
# ---------------------------------------------------------------------------
def _make_fourier_bases(backcast_length, forecast_length):
    H_back = backcast_length // 2 - 1
    H_fore = forecast_length // 2 - 1
    t_back = np.arange(backcast_length, dtype=np.float32) / backcast_length
    t_fore = np.arange(forecast_length, dtype=np.float32) / forecast_length
    basis_back = np.zeros((2 * H_back, backcast_length), dtype=np.float32)
    basis_fore = np.zeros((2 * H_fore, forecast_length), dtype=np.float32)
    for l in range(1, H_back + 1):
        basis_back[2 * (l - 1), :] = np.cos(2 * np.pi * l * t_back)
        basis_back[2 * (l - 1) + 1, :] = np.sin(2 * np.pi * l * t_back)
    for l in range(1, H_fore + 1):
        basis_fore[2 * (l - 1), :] = np.cos(2 * np.pi * l * t_fore)
        basis_fore[2 * (l - 1) + 1, :] = np.sin(2 * np.pi * l * t_fore)
    return basis_back, basis_fore


class FourierBasis:
    """JAX/Pallas equivalent of the PyTorch fourier_basis module."""

    def __init__(self, backcast_length, forecast_length):
        # Guard degenerate configs (H <= 0 would give zero-width bases/thetas).
        assert backcast_length >= 4 and forecast_length >= 4, (
            "backcast_length and forecast_length must be >= 4 for a non-empty "
            "Fourier basis")
        self.backcast_length = backcast_length
        self.forecast_length = forecast_length
        bb, bf = _make_fourier_bases(backcast_length, forecast_length)
        self.backcast_basis = jnp.asarray(bb)                    # f32 [Sb, Lb]
        self.forecast_basis = jnp.asarray(bf)                    # f32 [Sf, Lf]
        # bf16 copies so bf16 thetas never force an f32 upcast pass over theta.
        self.backcast_basis_bf16 = self.backcast_basis.astype(jnp.bfloat16)
        self.forecast_basis_bf16 = self.forecast_basis.astype(jnp.bfloat16)
        self.Sb, self.Lb = bb.shape
        self.Sf, self.Lf = bf.shape

    # --- batch-tile selection (generation-aware VMEM budget) ----------------
    def _default_tile_b(self, B, itemsize):
        align = 16 if itemsize <= 2 else 8           # bf16 sublane packing is (16, 128)
        # Double-buffered per-row VMEM traffic: theta_f + theta_b in, forecast + backcast out.
        row_bytes = 2 * (self.Sf + self.Sb + self.Lf + self.Lb) * itemsize
        vmem_budget = 16 * 1024 * 1024               # ~half the smallest default scoped VMEM
        cap_vmem = max(align, (vmem_budget // max(row_bytes, 1)) // align * align)
        tile = min(2048, cap_vmem)
        # Keep >= 4 grid steps (>= 2 feeds both v7x TensorCores) when the batch allows.
        target = max(align, ((pl.cdiv(B, 4) + align - 1) // align) * align)
        return max(align, min(tile, target))

    def __call__(self, theta_b, theta_f, tile_b=None, high_precision=False,
                 basis_buffer_count=None):
        """theta_b: [B, 2*(Lb//2-1)], theta_f: [B, 2*(Lf//2-1)] -> (forecast, backcast)."""
        assert theta_b.ndim == 2 and theta_f.ndim == 2
        assert theta_b.shape[0] == theta_f.shape[0]
        assert theta_b.shape[1] == self.Sb and theta_f.shape[1] == self.Sf
        B = theta_b.shape[0]
        Sf, Sb, Lf, Lb = self.Sf, self.Sb, self.Lf, self.Lb

        # Native-dtype path: bf16 stays bf16 (halves HBM reads); anything else runs f32.
        compute_dtype = jnp.result_type(theta_b.dtype, theta_f.dtype)
        if jnp.dtype(compute_dtype) == jnp.dtype(jnp.bfloat16):
            compute_dtype = jnp.bfloat16
            fbasis, bbasis = self.forecast_basis_bf16, self.backcast_basis_bf16
        else:
            compute_dtype = jnp.float32
            fbasis, bbasis = self.forecast_basis, self.backcast_basis
        theta_f = theta_f.astype(compute_dtype)      # no-op when already compute_dtype
        theta_b = theta_b.astype(compute_dtype)
        itemsize = jnp.dtype(compute_dtype).itemsize

        # Batch tile: largest VMEM-fitting multiple of the sublane alignment.
        align = 16 if itemsize <= 2 else 8
        if tile_b is None:
            tile_b = self._default_tile_b(B, itemsize)
        tile_b = max(align, (int(tile_b) // align) * align)
        grid = (pl.cdiv(B, tile_b),)                 # no pad: Pallas masks the ragged last block

        # Explicit scoped-VMEM limit so big tiles don't trip the v5e 16 MiB default;
        # capped well under v7x's 64 MiB physical VMEM.
        work_bytes = 2 * tile_b * (Sf + Sb + Lf + Lb) * itemsize
        basis_bytes = 2 * (Sf * Lf + Sb * Lb) * itemsize
        vmem_limit = int(min(48 * 1024 * 1024,
                             max(2 * (work_bytes + basis_bytes), 16 * 1024 * 1024)))

        # Bases have a constant index_map (loaded once, VMEM-resident). Optionally
        # single-buffer them (pl.Buffered(1)) for long-horizon configs.
        basis_kwargs = {}
        if basis_buffer_count is not None:
            basis_kwargs = dict(pipeline_mode=pl.Buffered(basis_buffer_count))

        precision = lax.Precision.HIGHEST if high_precision else None
        kernel = functools.partial(_fourier_basis_kernel, precision=precision)

        forecast, backcast = pl.pallas_call(
            kernel,
            out_shape=(
                jax.ShapeDtypeStruct((B, Lf), compute_dtype),
                jax.ShapeDtypeStruct((B, Lb), compute_dtype),
            ),
            grid=grid,
            in_specs=[
                # theta tiles stream over the batch axis (auto double-buffered).
                pl.BlockSpec((tile_b, Sf), lambda i: (i, 0)),
                pl.BlockSpec((tile_b, Sb), lambda i: (i, 0)),
                # bases: constant index_map -> fetched once, reused across all tiles.
                pl.BlockSpec((Sf, Lf), lambda i: (0, 0), **basis_kwargs),
                pl.BlockSpec((Sb, Lb), lambda i: (0, 0), **basis_kwargs),
            ],
            out_specs=(
                pl.BlockSpec((tile_b, Lf), lambda i: (i, 0)),
                pl.BlockSpec((tile_b, Lb), lambda i: (i, 0)),
            ),
            compiler_params=pltpu.CompilerParams(
                dimension_semantics=("parallel",),   # shard batch tiles across TCs (v7x)
                vmem_limit_bytes=vmem_limit,
            ),
        )(theta_f, theta_b, fbasis, bbasis)
        return forecast, backcast

    def reference(self, theta_b, theta_f):
        """Pure-JAX f32 reference (matches the PyTorch forward)."""
        forecast = theta_f.astype(jnp.float32) @ self.forecast_basis
        backcast = theta_b.astype(jnp.float32) @ self.backcast_basis
        return forecast, backcast


if __name__ == "__main__":
    # Small shapes consistent with the module.
    backcast_length, forecast_length = 16, 8        # Sb = 14, Sf = 6
    batch = 32

    module = FourierBasis(backcast_length, forecast_length)

    key = jax.random.PRNGKey(0)
    k_b, k_f = jax.random.split(key)
    theta_b = jax.random.normal(k_b, (batch, module.Sb), jnp.float32)
    theta_f = jax.random.normal(k_f, (batch, module.Sf), jnp.float32)

    ref_f, ref_b = module.reference(theta_b, theta_f)

    # Case 1: f32, tile-aligned batch, multi-step grid (tile_b=8 -> 4 steps).
    fc, bc = module(theta_b, theta_f, tile_b=8)
    jax.block_until_ready((fc, bc))
    assert fc.shape == (batch, forecast_length)
    assert bc.shape == (batch, backcast_length)
    assert jnp.allclose(fc, ref_f, atol=1e-5, rtol=1e-5)
    assert jnp.allclose(bc, ref_b, atol=1e-5, rtol=1e-5)

    # Case 2: f32, non-tile-aligned batch — no wrapper pad, Pallas masks the
    # ragged trailing block; auto tile selection.
    B2 = 27
    fc2, bc2 = module(theta_b[:B2], theta_f[:B2])
    jax.block_until_ready((fc2, bc2))
    assert fc2.shape == (B2, forecast_length)
    assert bc2.shape == (B2, backcast_length)
    assert jnp.allclose(fc2, ref_f[:B2], atol=1e-5, rtol=1e-5)
    assert jnp.allclose(bc2, ref_b[:B2], atol=1e-5, rtol=1e-5)

    # Case 3: bf16 thetas stay bf16 end-to-end (native-dtype path, f32 MXU accumulation).
    fc3, bc3 = module(theta_b.astype(jnp.bfloat16), theta_f.astype(jnp.bfloat16),
                      tile_b=16)
    jax.block_until_ready((fc3, bc3))
    assert fc3.dtype == jnp.bfloat16 and bc3.dtype == jnp.bfloat16
    assert jnp.allclose(fc3.astype(jnp.float32), ref_f, atol=0.15, rtol=0.05)
    assert jnp.allclose(bc3.astype(jnp.float32), ref_b, atol=0.15, rtol=0.05)

    print("KERNEL_OK")
</pallas_src>

<mosaic_0001>
module attributes {stable_mosaic.version = 11 : i64} {
  func.func @_fourier_basis_kernel(%arg0: i32, %arg1: memref<8x6xf32, #tpu.memory_space<vmem>>, %arg2: memref<8x14xf32, #tpu.memory_space<vmem>>, %arg3: memref<6x8xf32, #tpu.memory_space<vmem>>, %arg4: memref<14x16xf32, #tpu.memory_space<vmem>>, %arg5: memref<8x8xf32, #tpu.memory_space<vmem>>, %arg6: memref<8x16xf32, #tpu.memory_space<vmem>>) attributes {dimension_semantics = [#tpu.dimension_semantics<parallel>], iteration_bounds = array<i64: 4>, scalar_prefetch = 0 : i64, scratch_operands = 0 : i64, tpu.core_type = #tpu.core_type<tc>, window_params = [{transform_indices = @transform_0, window_bounds = array<i64: 8, 6>}, {transform_indices = @transform_1, window_bounds = array<i64: 8, 14>}, {pipeline_mode = #tpu.pipeline_mode<synchronous>, transform_indices = @transform_2, window_bounds = array<i64: 6, 8>}, {pipeline_mode = #tpu.pipeline_mode<synchronous>, transform_indices = @transform_3, window_bounds = array<i64: 14, 16>}, {transform_indices = @transform_4, window_bounds = array<i64: 8, 8>}, {transform_indices = @transform_5, window_bounds = array<i64: 8, 16>}]} {
    %c0 = arith.constant 0 : index
    %c0_0 = arith.constant 0 : index
    %0 = vector.load %arg1[%c0, %c0_0] : memref<8x6xf32, #tpu.memory_space<vmem>>, vector<8x6xf32>
    %c0_1 = arith.constant 0 : index
    %c0_2 = arith.constant 0 : index
    %1 = vector.load %arg3[%c0_1, %c0_2] : memref<6x8xf32, #tpu.memory_space<vmem>>, vector<6x8xf32>
    %cst = arith.constant dense<0.000000e+00> : vector<8x8xf32>
    %2 = tpu.matmul %0, %1, %cst {dimension_numbers = #tpu.dot_dimension_numbers<[1], [0], [0], [1], [0, 0, 1, 1], [], []>} : vector<8x6xf32>, vector<6x8xf32>, vector<8x8xf32> -> vector<8x8xf32>
    %c0_3 = arith.constant 0 : index
    %c0_4 = arith.constant 0 : index
    %3 = vector.load %arg5[%c0_3, %c0_4] : memref<8x8xf32, #tpu.memory_space<vmem>>, vector<8x8xf32>
    tpu.vector_store %arg5[%c0_3, %c0_4], %2 {strides = array<i32>} : memref<8x8xf32, #tpu.memory_space<vmem>>, vector<8x8xf32>,
    %c0_5 = arith.constant 0 : index
    %c0_6 = arith.constant 0 : index
    %4 = vector.load %arg2[%c0_5, %c0_6] : memref<8x14xf32, #tpu.memory_space<vmem>>, vector<8x14xf32>
    %c0_7 = arith.constant 0 : index
    %c0_8 = arith.constant 0 : index
    %5 = vector.load %arg4[%c0_7, %c0_8] : memref<14x16xf32, #tpu.memory_space<vmem>>, vector<14x16xf32>
    %cst_9 = arith.constant dense<0.000000e+00> : vector<8x16xf32>
    %6 = tpu.matmul %4, %5, %cst_9 {dimension_numbers = #tpu.dot_dimension_numbers<[1], [0], [0], [1], [0, 0, 1, 1], [], []>} : vector<8x14xf32>, vector<14x16xf32>, vector<8x16xf32> -> vector<8x16xf32>
    %c0_10 = arith.constant 0 : index
    %c0_11 = arith.constant 0 : index
    %7 = vector.load %arg6[%c0_10, %c0_11] : memref<8x16xf32, #tpu.memory_space<vmem>>, vector<8x16xf32>
    tpu.vector_store %arg6[%c0_10, %c0_11], %6 {strides = array<i32>} : memref<8x16xf32, #tpu.memory_space<vmem>>, vector<8x16xf32>,
    return
  }
  func.func @transform_0(%arg0: i32) -> (i32, i32) {
    %c0_i32 = arith.constant 0 : i32
    %c0_i32_0 = arith.constant 0 : i32
    return %arg0, %c0_i32 : i32, i32
  }
  func.func @transform_1(%arg0: i32) -> (i32, i32) {
    %c0_i32 = arith.constant 0 : i32
    %c0_i32_0 = arith.constant 0 : i32
    return %arg0, %c0_i32 : i32, i32
  }
  func.func @transform_2(%arg0: i32) -> (i32, i32) {
    %c0_i32 = arith.constant 0 : i32
    %c0_i32_0 = arith.constant 0 : i32
    %c0_i32_1 = arith.constant 0 : i32
    return %c0_i32, %c0_i32_0 : i32, i32
  }
  func.func @transform_3(%arg0: i32) -> (i32, i32) {
    %c0_i32 = arith.constant 0 : i32
    %c0_i32_0 = arith.constant 0 : i32
    %c0_i32_1 = arith.constant 0 : i32
    return %c0_i32, %c0_i32_0 : i32, i32
  }
  func.func @transform_4(%arg0: i32) -> (i32, i32) {
    %c0_i32 = arith.constant 0 : i32
    %c0_i32_0 = arith.constant 0 : i32
    return %arg0, %c0_i32 : i32, i32
  }
  func.func @transform_5(%arg0: i32) -> (i32, i32) {
    %c0_i32 = arith.constant 0 : i32
    %c0_i32_0 = arith.constant 0 : i32
    return %arg0, %c0_i32 : i32, i32
  }
}

</mosaic_0001>

<bundles_post_ra>
// kernel: tpu_custom_call.1
= control target key start
LH: loop header
LB: loop body
LE: loop exit
PB: predicated region body
PF: predicated region fallthrough
CT: control target
= control target key end

     0   :  { %s598_s18 = smov 0   ;;  %s630_s0 = inlined_call_operand.vmem [shape: f32[32,6], index: 0, kind: input, shape index: {}]   ;;  %s631_s1 = inlined_call_operand.vmem [shape: f32[32,14], index: 1, kind: input, shape index: {}]   ;;  %s632_s2 = inlined_call_operand.vmem [shape: f32[6,8], index: 2, kind: input, shape index: {}]   ;;  %s633_s3 = inlined_call_operand.vmem [shape: f32[14,16], index: 3, kind: input, shape index: {}]   ;;  %s634_s4 = inlined_call_operand.vmem [shape: f32[32,8], index: 4, kind: output, shape index: {0}]   ;;  %s635_s5 = inlined_call_operand.vmem [shape: f32[32,16], index: 5, kind: output, shape index: {1}]  }
   0x1 LB: > { %s508_s19 = sadd.s32 4294967295, %s562_s18   ;;  %p512_p0 = scmp.ge.s32.totalorder %s562_s18, 1  ;;  %s562_s18 = sphi %s598_s18, %s16_s18  }
   0x2   : > { %p198_p1 = scmp.lt.s32.totalorder %s562_s18, 5 }
   0x4   : > { %p199_p2 = pnand %p512_p0, %p198_p1 }
   0x5   : > { %vm254_vm0 = vcmask (!%p199_p2), 1045504   ;;  %v331_v0 = vld [vmem:[%s633_s3] sm:$0xff] (!%p199_p2)  ;;  %v332_v1 = vld [vmem:[%s633_s3 + $0x8] sm:$0x3f] (!%p199_p2)  ;;  %v564_v2 = vmov (!%p199_p2), 0.0|0.0   ;;  %vm565_vm1 = vmmov (!%p199_p2), 1  }
   0x6   : > { %202 = sbr.rel (%p199_p2) target bundleno = 231 (0xe7), region = 36  ;;  %540 = vmatprep.subr.bf16.mxu1 (!%p199_p2), %v564_v2  ;;  %v541_v3 = vpack.c.bf16 (!%p199_p2), %v332_v1, %v331_v0  ;;  %vm542_vm2 = vmpackc.low (!%p199_p2), %vm254_vm0, %vm565_vm1  ;;  %v249_v4 = vld [vmem:[%s632_s2] sm:$0x3f] (!%p199_p2)  ;;  %p232_p3 = scmp.lt.s32.totalorder (!%p199_p2), %s508_s19, 3  ;;  %v566_v5 = vmov (!%p199_p2), 0.0   ;;  %vm567_vm3 = vmmov (!%p199_p2), 0  }
   0x7   : > { %528 = vmatprep.subr.mxu0 (!%p199_p2), %v566_v5  ;;  %530 = vmatprep.mubr.msk.f32.mxu0 (!%p199_p2), %vm567_vm3, %v566_v5  ;;  %vm250_vm4 = vcmask (!%p199_p2), 48128   ;;  %vm333_vm5 = vcmask (!%p199_p2), 113664   ;;  %vm328_vm6 = vcmask (!%p199_p2), 64512   ;;  %vm410_vm7 = vcmask (!%p199_p2), 130048  }
   0x8   : > { %543 = vmatpush3.bf16.msk.msra.mxu1 (!%p199_p2), %vm542_vm2, %v541_v3  ;;  %529 = vmatpush3.msk.msra.mxu0 (!%p199_p2), %vm254_vm0, %v249_v4 }
   0x9   : > { %537 = vmatprep.mubr.msk.f32.mxu1 (!%p199_p2), %vm567_vm3, %v566_v5 }
   0xd   : > { %s637_s19 = smov (!%p232_p3, %s508_s19), 3 }
   0xe   : > { %s513_s26 = sshll.u32 %s637_s19, 3 }
   0xf   : > { %s235_s29 = scalar_lea.vmem %s630_s0, %s513_s26  ;;  %s239_s7 = scalar_lea.vmem %s631_s1, %s513_s26 }
  0x10   : > { %v248_v6 = vld [vmem:[%s235_s29] sm:$0xff]  ;;  %s243_s10 = scalar_lea.vmem %s634_s4, %s513_s26  ;;  %s247_s13 = scalar_lea.vmem %s635_s5, %s513_s26 }
  0x11   : > { %v330_v7 = vld [vmem:[%s239_s7] sm:$0xff]  ;;  %531 = vmatmul.mubr.msk.f32.vlgmr.msra.gmra.mrb[0].mxu0 %vm250_vm4, %v248_v6 }
  0x12   : > { %538 = vmatmul.mubr.msk.f32.vlgmr.msra.gmra.mrb[0].mxu1 %vm333_vm5, %v330_v7 }
  0xe4   : > { %v324_v8 = vpop.f32.mrb[0].mxu0 }
  0xe5   : > { %v406_v9 = vpop.f32.mrb[0].mxu1  ;;  %329 = vst.msk [vmem:[%s243_s10] sm:$0xff] %vm328_vm6, %v324_v8  ;;  %v532_v10 = vpop.f32.mrb[1].mxu0 }
  0xe6   : > { %411 = vst.msk [vmem:[%s247_s13] sm:$0xff] %vm410_vm7, %v406_v9  ;;  %v539_v11 = vpop.f32.mrb[1].mxu1 }
  0xe7 PF: > { %s16_s18 = sadd.s32 1, %s562_s18  }
  0xe8   : > { %p13_p4 = scmp.ge.s32.totalorder %s16_s18, 6  }
  0xea   :  { %15 = sbr.rel (!%p13_p4) target bundleno = 1 (0x1), region = 81 }

</bundles_post_ra>
